<compile_context>
chip_gen: v7x
topology: tpu7x:2x2x1
jax: 0.10.0
libtpu: 0.0.40
codegen_flags: <defaults>
</compile_context>

<pallas_src>
import functools

import jax
import jax.numpy as jnp
from jax.experimental import pallas as pl
from jax.experimental.pallas import tpu as pltpu


def _attn_pool_kernel(emb_ref, mask_ref, w_ref, out_ref, m_sc, l_sc, acc_sc,
                      *, batch, seq_len, guard_batch, guard_seq):
    """One (Bt, St) tile of online-softmax attention pooling.

    emb_ref:  (Bt, St, H) token embeddings, native dtype
    mask_ref: (Bt, St)    int32 mask (nonzero = keep)
    w_ref:    (H, 1)      attention projection weight column
    out_ref:  (Bt, H)     pooled output (written on the last seq step)
    m_sc/l_sc:(Bt, 1)     f32 running max / running denominator
    acc_sc:   (Bt, H)     f32 running weighted sum
    """
    b_idx = pl.program_id(0)
    s_idx = pl.program_id(1)

    @pl.when(s_idx == 0)
    def _():
        m_sc[...] = jnp.full_like(m_sc, -jnp.inf)
        l_sc[...] = jnp.zeros_like(l_sc)
        acc_sc[...] = jnp.zeros_like(acc_sc)

    emb = emb_ref[...]                                    # (Bt, St, H)
    bt, st, h = emb.shape
    valid = mask_ref[...] != 0                            # (Bt, St)

    if guard_batch or guard_seq:
        # Ragged tail handling (no HBM-side padding copy of the embeddings):
        # positions past B / S read unspecified data. Mark them invalid AND
        # zero the embedding tail so "p == 0 but emb == Inf/NaN" cannot poison
        # the weighted-sum matmul.
        in_bounds = None
        if guard_seq:
            col = s_idx * st + jax.lax.broadcasted_iota(jnp.int32, (bt, st), 1)
            in_bounds = col < seq_len
        if guard_batch:
            row = b_idx * bt + jax.lax.broadcasted_iota(jnp.int32, (bt, st), 0)
            rb = row < batch
            in_bounds = rb if in_bounds is None else jnp.logical_and(in_bounds, rb)
        valid = jnp.logical_and(valid, in_bounds)
        emb = jnp.where(in_bounds[:, :, None], emb, jnp.zeros((), emb.dtype))

    # Score projection: the big tile streams through the MXU as the lhs,
    # contracting its lane axis (H) against the stationary (H, 1) weight
    # column -> no transpose of the tile. Only the small (Bt*St, 1) result is
    # relaid out into a lane-dense (Bt, St) row block for the softmax.
    sc = jnp.dot(emb.reshape(bt * st, h), w_ref[...],
                 preferred_element_type=jnp.float32)      # (Bt*St, 1)
    scores = jnp.where(valid, sc.reshape(bt, st), -jnp.inf)   # (Bt, St), f32

    # Online softmax update (robust to tiles where a row is fully masked).
    m_prev = m_sc[...]                                    # (Bt, 1)
    m_new = jnp.maximum(m_prev, scores.max(axis=-1, keepdims=True))
    m_safe = jnp.where(m_new == -jnp.inf, jnp.float32(0.0), m_new)
    alpha = jnp.exp(m_prev - m_safe)                      # (Bt, 1)
    p = jnp.exp(scores - m_safe)                          # (Bt, St)
    l_sc[...] = alpha * l_sc[...] + p.sum(axis=-1, keepdims=True)

    # Weighted sum: standard batched (1, St) @ (St, H) MXU contraction.
    upd = jnp.einsum("bqk,bkd->bqd", p.astype(emb.dtype)[:, None, :], emb,
                     preferred_element_type=jnp.float32)  # (Bt, 1, H)
    acc_sc[...] = alpha * acc_sc[...] + upd[:, 0, :]
    m_sc[...] = m_new

    @pl.when(s_idx == pl.num_programs(1) - 1)
    def _():
        inv_l = pl.reciprocal(l_sc[...], approx=False)    # off the divide path
        out_ref[...] = (acc_sc[...] * inv_l).astype(out_ref.dtype)


def attention_pooling(token_embeddings, attention_mask, weight, bias=None,
                      *, block_bytes=16 * 1024 * 1024):
    """token_embeddings: (B, S, H); attention_mask: (B, S) bool/int;
    weight: (1, H) (PyTorch Linear layout); bias: (1,) (unused, see note)."""
    B, S, H = token_embeddings.shape
    dtype = token_embeddings.dtype
    itemsize = jnp.dtype(dtype).itemsize

    # The Linear bias adds the same constant to every (unmasked) score of a
    # row; softmax is shift-invariant, so it cannot change the output.
    del bias

    # ---- batch tile (dtype-aware sublane packing) ---------------------------
    packed = {4: 8, 2: 16, 1: 32}.get(itemsize, 8)
    if B <= 8:
        Bt = B                      # single tile; block dim == full array dim
    else:
        Bt = packed
        # Keep >= 2 batch grid steps so the "parallel" axis can be sharded
        # across both TensorCores on megacore (v7x) parts.
        while Bt > 8 and -(-B // Bt) < 2:
            Bt //= 2

    # ---- sequence tile ------------------------------------------------------
    # Whole sequence if the (Bt, S, H) block fits the streaming budget,
    # otherwise a multiple of 128 sized so one embedding block ~= block_bytes.
    if Bt * S * H * itemsize <= block_bytes or S <= 128:
        St = S
    else:
        St = max(128, (block_bytes // (Bt * H * itemsize)) // 128 * 128)

    guard_batch = (B % Bt) != 0
    guard_seq = (S % St) != 0

    mask = attention_mask.astype(jnp.int32)             # (B, S); no padding copy
    w_col = jnp.asarray(weight, dtype=dtype).reshape(H, 1)

    grid = (pl.cdiv(B, Bt), pl.cdiv(S, St))             # reduction (seq) axis last

    # Explicit VMEM budget: 2x double-buffered embedding block + headroom.
    # 16 MiB default blocks -> ~44 MiB, fits v7x's 64 MiB physical VMEM and
    # raises the 16/32 MiB default scoped limits on v5e/v6e.
    emb_block_bytes = Bt * St * H * itemsize
    vmem_limit = max(32 << 20, min(2 * emb_block_bytes + (12 << 20), 100 << 20))

    kernel = functools.partial(_attn_pool_kernel, batch=B, seq_len=S,
                               guard_batch=guard_batch, guard_seq=guard_seq)

    # TODO(synk): when the mask is a pure length mask, per-row lengths could be
    # passed via scalar prefetch to drop the (B, S) mask HBM stream entirely.
    return pl.pallas_call(
        kernel,
        out_shape=jax.ShapeDtypeStruct((B, H), dtype),
        grid_spec=pltpu.PrefetchScalarGridSpec(
            num_scalar_prefetch=0,
            grid=grid,
            in_specs=[
                pl.BlockSpec((Bt, St, H), lambda b, s: (b, s, 0)),
                pl.BlockSpec((Bt, St), lambda b, s: (b, s)),
                pl.BlockSpec((H, 1), lambda b, s: (0, 0)),
            ],
            out_specs=pl.BlockSpec((Bt, H), lambda b, s: (b, 0)),
            scratch_shapes=[
                pltpu.VMEM((Bt, 1), jnp.float32),   # running max
                pltpu.VMEM((Bt, 1), jnp.float32),   # running denominator
                pltpu.VMEM((Bt, H), jnp.float32),   # running weighted sum
            ],
        ),
        compiler_params=pltpu.CompilerParams(
            dimension_semantics=("parallel", "arbitrary"),
            vmem_limit_bytes=vmem_limit),
    )(token_embeddings, mask, w_col)


def _reference(token_embeddings, attention_mask, weight, bias):
    # Pure-JAX reference mirroring the PyTorch forward exactly (with bias).
    emb = token_embeddings.astype(jnp.float32)
    scores = jnp.einsum("bsh,oh->bso", emb, weight.astype(jnp.float32))[..., 0]
    scores = scores + bias.astype(jnp.float32)[0]
    scores = jnp.where(attention_mask.astype(bool), scores, -jnp.inf)
    w = jax.nn.softmax(scores, axis=-1)[..., None]
    return jnp.sum(emb * w, axis=1)


if __name__ == "__main__":
    key = jax.random.PRNGKey(0)
    keys = jax.random.split(key, 12)
    bound = 0.2

    # ---- Test 1: small single-tile path (B=2, S=8, H=32) --------------------
    B, S, H = 2, 8, 32
    emb1 = jax.random.normal(keys[0], (B, S, H), dtype=jnp.float32)
    lengths1 = jnp.array([6, 8], dtype=jnp.int32)
    mask1 = (jnp.arange(S)[None, :] < lengths1[:, None]).astype(jnp.int32)
    w1 = jax.random.uniform(keys[1], (1, H), minval=-bound, maxval=bound)
    b1 = jax.random.uniform(keys[2], (1,), minval=-bound, maxval=bound)

    pooled1 = jax.block_until_ready(attention_pooling(emb1, mask1, w1, b1))
    ref1 = _reference(emb1, mask1, w1, b1)
    assert pooled1.shape == (B, H)
    assert jnp.allclose(pooled1, ref1, atol=1e-5, rtol=1e-5), "mismatch (test 1)"

    # ---- Test 2: batch tiling (ragged batch) + seq tiling, f32 --------------
    B2, S2, H2 = 10, 256, 32
    emb2 = jax.random.normal(keys[3], (B2, S2, H2), dtype=jnp.float32)
    lengths2 = jax.random.randint(keys[4], (B2,), 1, S2 + 1)
    mask2 = (jnp.arange(S2)[None, :] < lengths2[:, None]).astype(jnp.int32)
    # One row whose first sequence tile is fully masked (valid tokens start
    # late) to check the online-softmax -inf handling against the reference.
    mask2 = mask2.at[3].set((jnp.arange(S2) >= 200).astype(jnp.int32))
    w2 = jax.random.uniform(keys[5], (1, H2), minval=-bound, maxval=bound)
    b2 = jax.random.uniform(keys[6], (1,), minval=-bound, maxval=bound)

    # Small block budget forces St=128 -> grid (2 batch steps, 2 seq steps).
    pooled2 = jax.block_until_ready(
        attention_pooling(emb2, mask2, w2, b2, block_bytes=8 * 1024))
    ref2 = _reference(emb2, mask2, w2, b2)
    assert pooled2.shape == (B2, H2)
    assert jnp.allclose(pooled2, ref2, atol=1e-4, rtol=1e-4), "mismatch (test 2)"

    # ---- Test 3: ragged seq tail (S not a multiple of St) + ragged batch ----
    B3, S3, H3 = 10, 200, 32
    emb3 = jax.random.normal(keys[7], (B3, S3, H3), dtype=jnp.float32)
    lengths3 = jax.random.randint(keys[8], (B3,), 1, S3 + 1)
    mask3 = (jnp.arange(S3)[None, :] < lengths3[:, None]).astype(jnp.int32)
    w3 = jax.random.uniform(keys[9], (1, H3), minval=-bound, maxval=bound)
    b3 = jax.random.uniform(keys[10], (1,), minval=-bound, maxval=bound)

    pooled3 = jax.block_until_ready(
        attention_pooling(emb3, mask3, w3, b3, block_bytes=8 * 1024))
    ref3 = _reference(emb3, mask3, w3, b3)
    assert pooled3.shape == (B3, H3)
    assert jnp.allclose(pooled3, ref3, atol=1e-4, rtol=1e-4), "mismatch (test 3)"

    # ---- Test 4: bfloat16 path (dtype-aware batch tile, looser tolerance) ---
    B4, S4, H4 = 12, 128, 64
    emb4 = jax.random.normal(keys[11], (B4, S4, H4), dtype=jnp.float32)
    emb4 = emb4.astype(jnp.bfloat16)
    lengths4 = (jnp.arange(B4, dtype=jnp.int32) % S4) + 1
    mask4 = (jnp.arange(S4)[None, :] < lengths4[:, None]).astype(jnp.int32)
    w4 = jax.random.uniform(keys[0], (1, H4), minval=-bound, maxval=bound)
    b4 = jnp.zeros((1,), jnp.float32)

    pooled4 = jax.block_until_ready(
        attention_pooling(emb4, mask4, w4.astype(jnp.bfloat16), b4))
    ref4 = _reference(emb4, mask4, w4.astype(jnp.bfloat16), b4)
    assert pooled4.shape == (B4, H4)
    assert jnp.allclose(pooled4.astype(jnp.float32), ref4,
                        atol=3e-2, rtol=3e-2), "mismatch (test 4, bf16)"

    print("KERNEL_OK")
</pallas_src>

<mosaic_0001>
module attributes {stable_mosaic.version = 11 : i64} {
  func.func @_attn_pool_kernel(%arg0: i32, %arg1: i32, %arg2: memref<2x8x32xf32, #tpu.memory_space<vmem>>, %arg3: memref<2x8xi32, #tpu.memory_space<vmem>>, %arg4: memref<32x1xf32, #tpu.memory_space<vmem>>, %arg5: memref<2x32xf32, #tpu.memory_space<vmem>>, %arg6: memref<2x1xf32, #tpu.memory_space<vmem>>, %arg7: memref<2x1xf32, #tpu.memory_space<vmem>>, %arg8: memref<2x32xf32, #tpu.memory_space<vmem>>) attributes {dimension_semantics = [#tpu.dimension_semantics<parallel>, #tpu.dimension_semantics<arbitrary>], iteration_bounds = array<i64: 1, 1>, scalar_prefetch = 0 : i64, scratch_operands = 3 : i64, tpu.core_type = #tpu.core_type<tc>, window_params = [{transform_indices = @transform_0, window_bounds = array<i64: 2, 8, 32>}, {transform_indices = @transform_1, window_bounds = array<i64: 2, 8>}, {pipeline_mode = #tpu.pipeline_mode<synchronous>, transform_indices = @transform_2, window_bounds = array<i64: 32, 1>}, {transform_indices = @transform_3, window_bounds = array<i64: 2, 32>}]} {
    %c0_i32 = arith.constant 0 : i32
    %0 = arith.cmpi eq, %arg1, %c0_i32 : i32
    %1 = arith.extui %0 : i1 to i32
    %c0_i32_0 = arith.constant 0 : i32
    %2 = arith.cmpi ne, %1, %c0_i32_0 : i32
    scf.if %2 {
      %cst_28 = arith.constant 0xFF800000 : f32
      %44 = vector.broadcast %cst_28 : f32 to vector<2x1xf32>
      %c0_29 = arith.constant 0 : index
      %c0_30 = arith.constant 0 : index
      %45 = vector.load %arg6[%c0_29, %c0_30] : memref<2x1xf32, #tpu.memory_space<vmem>>, vector<2x1xf32>
      tpu.vector_store %arg6[%c0_29, %c0_30], %44 {strides = array<i32>} : memref<2x1xf32, #tpu.memory_space<vmem>>, vector<2x1xf32>,
      %cst_31 = arith.constant 0.000000e+00 : f32
      %46 = vector.broadcast %cst_31 : f32 to vector<2x1xf32>
      %c0_32 = arith.constant 0 : index
      %c0_33 = arith.constant 0 : index
      %47 = vector.load %arg7[%c0_32, %c0_33] : memref<2x1xf32, #tpu.memory_space<vmem>>, vector<2x1xf32>
      tpu.vector_store %arg7[%c0_32, %c0_33], %46 {strides = array<i32>} : memref<2x1xf32, #tpu.memory_space<vmem>>, vector<2x1xf32>,
      %cst_34 = arith.constant 0.000000e+00 : f32
      %48 = vector.broadcast %cst_34 : f32 to vector<2x32xf32>
      %c0_35 = arith.constant 0 : index
      %c0_36 = arith.constant 0 : index
      %49 = vector.load %arg8[%c0_35, %c0_36] : memref<2x32xf32, #tpu.memory_space<vmem>>, vector<2x32xf32>
      tpu.vector_store %arg8[%c0_35, %c0_36], %48 {strides = array<i32>} : memref<2x32xf32, #tpu.memory_space<vmem>>, vector<2x32xf32>,
    } else {
    }
    %c0 = arith.constant 0 : index
    %c0_1 = arith.constant 0 : index
    %c0_2 = arith.constant 0 : index
    %3 = vector.load %arg2[%c0, %c0_1, %c0_2] : memref<2x8x32xf32, #tpu.memory_space<vmem>>, vector<2x8x32xf32>
    %c0_3 = arith.constant 0 : index
    %c0_4 = arith.constant 0 : index
    %4 = vector.load %arg3[%c0_3, %c0_4] : memref<2x8xi32, #tpu.memory_space<vmem>>, vector<2x8xi32>
    %c0_i32_5 = arith.constant 0 : i32
    %5 = vector.broadcast %c0_i32_5 : i32 to vector<2x8xi32>
    %6 = arith.cmpi ne, %4, %5 : vector<2x8xi32>
    %7 = vector.shape_cast %3 : vector<2x8x32xf32> to vector<16x32xf32>
    %c0_6 = arith.constant 0 : index
    %c0_7 = arith.constant 0 : index
    %8 = vector.load %arg4[%c0_6, %c0_7] : memref<32x1xf32, #tpu.memory_space<vmem>>, vector<32x1xf32>
    %cst = arith.constant dense<0.000000e+00> : vector<16x1xf32>
    %9 = tpu.matmul %7, %8, %cst {dimension_numbers = #tpu.dot_dimension_numbers<[1], [0], [0], [1], [0, 0, 1, 1], [], []>} : vector<16x32xf32>, vector<32x1xf32>, vector<16x1xf32> -> vector<16x1xf32>
    %10 = vector.shape_cast %9 : vector<16x1xf32> to vector<2x8xf32>
    %cst_8 = arith.constant 0xFF800000 : f32
    %11 = vector.broadcast %cst_8 : f32 to vector<2x8xf32>
    %12 = arith.select %6, %10, %11 : vector<2x8xi1>, vector<2x8xf32>
    %c0_9 = arith.constant 0 : index
    %c0_10 = arith.constant 0 : index
    %13 = vector.load %arg6[%c0_9, %c0_10] : memref<2x1xf32, #tpu.memory_space<vmem>>, vector<2x1xf32>
    %cst_11 = arith.constant dense<0xFF800000> : vector<2xf32>
    %14 = vector.multi_reduction <maximumf>, %12, %cst_11 [1] : vector<2x8xf32> to vector<2xf32>
    %15 = vector.shape_cast %14 : vector<2xf32> to vector<2x1xf32>
    %16 = arith.maximumf %13, %15 : vector<2x1xf32>
    %cst_12 = arith.constant 0xFF800000 : f32
    %17 = vector.broadcast %cst_12 : f32 to vector<2x1xf32>
    %18 = arith.cmpf oeq, %16, %17 : vector<2x1xf32>
    %cst_13 = arith.constant 0.000000e+00 : f32
    %19 = vector.broadcast %cst_13 : f32 to vector<2x1xf32>
    %20 = arith.select %18, %19, %16 : vector<2x1xi1>, vector<2x1xf32>
    %21 = arith.subf %13, %20 : vector<2x1xf32>
    %22 = math.exp %21 : vector<2x1xf32>
    %23 = vector.broadcast %20 : vector<2x1xf32> to vector<2x8xf32>
    %24 = arith.subf %12, %23 : vector<2x8xf32>
    %25 = math.exp %24 : vector<2x8xf32>
    %c0_14 = arith.constant 0 : index
    %c0_15 = arith.constant 0 : index
    %26 = vector.load %arg7[%c0_14, %c0_15] : memref<2x1xf32, #tpu.memory_space<vmem>>, vector<2x1xf32>
    %27 = arith.mulf %22, %26 : vector<2x1xf32>
    %cst_16 = arith.constant dense<0.000000e+00> : vector<2xf32>
    %28 = vector.multi_reduction <add>, %25, %cst_16 [1] : vector<2x8xf32> to vector<2xf32>
    %29 = vector.shape_cast %28 : vector<2xf32> to vector<2x1xf32>
    %30 = arith.addf %27, %29 : vector<2x1xf32>
    %c0_17 = arith.constant 0 : index
    %c0_18 = arith.constant 0 : index
    %31 = vector.load %arg7[%c0_17, %c0_18] : memref<2x1xf32, #tpu.memory_space<vmem>>, vector<2x1xf32>
    tpu.vector_store %arg7[%c0_17, %c0_18], %30 {strides = array<i32>} : memref<2x1xf32, #tpu.memory_space<vmem>>, vector<2x1xf32>,
    %32 = vector.shape_cast %25 : vector<2x8xf32> to vector<2x1x8xf32>
    "tpu.trace_start"() <{level = 10 : i32, message = "bqk,bkd->bqd"}> : () -> ()
    %cst_19 = arith.constant dense<0.000000e+00> : vector<2x1x32xf32>
    %33 = tpu.matmul %32, %3, %cst_19 {dimension_numbers = #tpu.dot_dimension_numbers<[2], [1], [1], [2], [0, 0, 0, 1, 1, 2], [0], [0]>} : vector<2x1x8xf32>, vector<2x8x32xf32>, vector<2x1x32xf32> -> vector<2x1x32xf32>
    "tpu.trace_stop"() : () -> ()
    %c0_20 = arith.constant 0 : index
    %c0_21 = arith.constant 0 : index
    %34 = vector.load %arg8[%c0_20, %c0_21] : memref<2x32xf32, #tpu.memory_space<vmem>>, vector<2x32xf32>
    %35 = vector.broadcast %22 : vector<2x1xf32> to vector<2x32xf32>
    %36 = arith.mulf %35, %34 : vector<2x32xf32>
    %37 = vector.shape_cast %33 : vector<2x1x32xf32> to vector<2x32xf32>
    %38 = arith.addf %36, %37 : vector<2x32xf32>
    %c0_22 = arith.constant 0 : index
    %c0_23 = arith.constant 0 : index
    %39 = vector.load %arg8[%c0_22, %c0_23] : memref<2x32xf32, #tpu.memory_space<vmem>>, vector<2x32xf32>
    tpu.vector_store %arg8[%c0_22, %c0_23], %38 {strides = array<i32>} : memref<2x32xf32, #tpu.memory_space<vmem>>, vector<2x32xf32>,
    %c0_24 = arith.constant 0 : index
    %c0_25 = arith.constant 0 : index
    %40 = vector.load %arg6[%c0_24, %c0_25] : memref<2x1xf32, #tpu.memory_space<vmem>>, vector<2x1xf32>
    tpu.vector_store %arg6[%c0_24, %c0_25], %16 {strides = array<i32>} : memref<2x1xf32, #tpu.memory_space<vmem>>, vector<2x1xf32>,
    %c0_i32_26 = arith.constant 0 : i32
    %41 = arith.cmpi eq, %arg1, %c0_i32_26 : i32
    %42 = arith.extui %41 : i1 to i32
    %c0_i32_27 = arith.constant 0 : i32
    %43 = arith.cmpi ne, %42, %c0_i32_27 : i32
    scf.if %43 {
      %c0_28 = arith.constant 0 : index
      %c0_29 = arith.constant 0 : index
      %44 = vector.load %arg7[%c0_28, %c0_29] : memref<2x1xf32, #tpu.memory_space<vmem>>, vector<2x1xf32>
      %45 = tpu.reciprocal %44 : vector<2x1xf32> -> vector<2x1xf32>
      %c0_30 = arith.constant 0 : index
      %c0_31 = arith.constant 0 : index
      %46 = vector.load %arg8[%c0_30, %c0_31] : memref<2x32xf32, #tpu.memory_space<vmem>>, vector<2x32xf32>
      %47 = vector.broadcast %45 : vector<2x1xf32> to vector<2x32xf32>
      %48 = arith.mulf %46, %47 : vector<2x32xf32>
      %c0_32 = arith.constant 0 : index
      %c0_33 = arith.constant 0 : index
      %49 = vector.load %arg5[%c0_32, %c0_33] : memref<2x32xf32, #tpu.memory_space<vmem>>, vector<2x32xf32>
      tpu.vector_store %arg5[%c0_32, %c0_33], %48 {strides = array<i32>} : memref<2x32xf32, #tpu.memory_space<vmem>>, vector<2x32xf32>,
    } else {
    }
    return
  }
  func.func @transform_0(%arg0: i32, %arg1: i32) -> (i32, i32, i32) {
    %c0_i32 = arith.constant 0 : i32
    %c0_i32_0 = arith.constant 0 : i32
    return %arg0, %arg1, %c0_i32 : i32, i32, i32
  }
  func.func @transform_1(%arg0: i32, %arg1: i32) -> (i32, i32) {
    %c0_i32 = arith.constant 0 : i32
    return %arg0, %arg1 : i32, i32
  }
  func.func @transform_2(%arg0: i32, %arg1: i32) -> (i32, i32) {
    %c0_i32 = arith.constant 0 : i32
    %c0_i32_0 = arith.constant 0 : i32
    %c0_i32_1 = arith.constant 0 : i32
    return %c0_i32, %c0_i32_0 : i32, i32
  }
  func.func @transform_3(%arg0: i32, %arg1: i32) -> (i32, i32) {
    %c0_i32 = arith.constant 0 : i32
    %c0_i32_0 = arith.constant 0 : i32
    return %arg0, %c0_i32 : i32, i32
  }
}

</mosaic_0001>

<bundles_post_ra>
// kernel: tpu_custom_call.1
= control target key start
LH: loop header
LB: loop body
LE: loop exit
PB: predicated region body
PF: predicated region fallthrough
CT: control target
= control target key end

     0   :  { %vm32_vm0 = vcmask 261120   ;;  %s531_s0 = inlined_call_operand.vmem [shape: f32[2,8,32], index: 0, kind: input, shape index: {}]   ;;  %s532_s1 = inlined_call_operand.vmem [shape: s32[2,8], index: 1, kind: input, shape index: {}]   ;;  %s533_s2 = inlined_call_operand.vmem [shape: f32[32,1], index: 2, kind: input, shape index: {}]   ;;  %s534_s3 = inlined_call_operand.hbm [shape: f32[2,32], index: 3, kind: output, shape index: {}]  }
   0x1   :  { %v28_v0 = vld [vmem:[%s533_s2] sm:$0xff]  ;;  %v29_v1 = vld [vmem:[%s533_s2 + $0x8] sm:$0xff]  ;;  %v30_v2 = vld [vmem:[%s533_s2 + $0x10] sm:$0xff] }
   0x2   :  { %v409_v3 = vpack.c.bf16 %v29_v1, %v28_v0  ;;  %v31_v4 = vld [vmem:[%s533_s2 + $0x18] sm:$0xff]  ;;  %v24_v5 = vld [vmem:[%s531_s0] sm:$0xff] }
   0x3   :  { %v413_v6 = vpack.c.bf16 %v31_v4, %v30_v2  ;;  %396 = vmatprep.mubr.msk.f32.mxu0 %vm32_vm0, %v24_v5 }
   0x4   :  { %8 = vsyncpa [#allocation6], 0  ;;  %410 = vmatprep.subr.bf16.mxu0 %v409_v3  ;;  %v499_v7 = vld [vmem:[%s531_s0 + $0x8] sm:$0xff]  ;;  %v455_v8 = vmov 0   ;;  %v122_v11 = vlaneseq  ;;  %v26_v16 = vld [vmem:[%s532_s1] sm:$0x3] }
   0x5   :  { %412 = vmatpush3.bf16.msra.mxu0 %v409_v3  ;;  %423 = vset.pattern.permute.xlu0 %v455_v8  ;;  %vm132_vm1 = vcmask 1041409   ;;  %vm27_vm2 = vcmp.ne.s32.totalorder %v26_v16, 0  ;;  %vm137_vm3 = vcmask 58368   ;;  %vm19_vm4 = vcmask 1024   ;;  %s460_s0 = smov [#allocation5]  }
   0x6   :  { %414 = vmatprep.subr.bf16.mxu0 %v413_v6  ;;  %424 = vset.pattern.permute.xlu1 %v455_v8  ;;  %v123_v12 = vand.u32 127, %v122_v11  ;;  %v125_v13 = vshrl.u32 %v122_v11, 7  ;;  %v456_v23 = vmov -inf   ;;  %v457_v24 = vmov 0.0   ;;  %s366_s1 = sshll.u32 %s460_s0, 4  ;;  %s367_s1 = int_to_ptr.vmem [resolvable:$true] %s366_s1 }
   0x7   :  { %20 = vst.msk [vmem:[#allocation2] sm:$0x3] %vm19_vm4, %v456_v23  ;;  %21 = vst.msk [vmem:[#allocation3] sm:$0x3] %vm19_vm4, %v457_v24  ;;  %399 = vmatprep.subr.mxu1 %v457_v24  ;;  %vm22_vm6 = vcmask 254976   ;;  %vm458_vm7 = vmmov 0   ;;  %p436_p1 = scmp.lt.s32.totalorder %s367_s1, %s367_s1 }
   0x8   :  { %v126_v15 = vsub.s32 %v123_v12, %v125_v13  ;;  %400 = vmatpush3.msra.mxu1 %v24_v5  ;;  %23 = vst.msk [vmem:[#allocation4] sm:$0x3] %vm22_vm6, %v457_v24  ;;  %401 = vmatprep.mubr.msk.f32.mxu1 %vm458_vm7, %v457_v24  ;;  %v459_v35 = vmov 1966171168   ;;  %vm186_vm8 = vcmask 64512   ;;  %s431_s25 = scalar_lea.vmem %s367_s1, 32 }
   0x9   :  { %416 = vmatpush3.bf16.msra.mxu0 %v413_v6  ;;  %404 = vmatprep.subr.mxu1 %v457_v24  ;;  %v165_v36 = vunpack.c.l.s4 %v459_v35  ;;  %p432_p0 = scmp.ne.s32.totalorder %s367_s1, %s431_s25  ;;  %p437_p2 = scmp.lt.s32.totalorder %s431_s25, %s431_s25 }
   0xb   :  { %v166_v37 = vunpack.c.0.s8 %v165_v36  ;;  %p438_p3 = por %p437_p2, %p436_p1 }
   0xc   :  { %397 = vmatmul.mubr.msk.f32.vlgmr.msra.gmra.mrb[0].mxu0 %vm32_vm0, %v499_v7 }
   0xd   :  { %v169_v38 = vsub.s32 %v166_v37, %v125_v13  ;;  %p439_p4 = pnand %p438_p3, %p432_p0 }
   0xe   :  { %v136_v25 = vld [vmem:[#allocation2] sm:$0x3]  ;;  %v155_v45 = vld [vmem:[#allocation3] sm:$0x3] }
   0xf   :  { %v331_v53 = vld [vmem:[#allocation4] sm:$0x3] }
  0xdf   :  { %v398_v9 = vpop.f32.mrb[0].mxu0 }
  0xe0   :  { %v105_v10 = vpop.f32.mrb[1].mxu0 }
  0xe1   :  { %117 = vperm.xlu0 %423, %v105_v10  }
  0xe5   :  { %120 = vperm.xlu0 %423, %v398_v9  }
 0x160   :  { %v118_v14 = vpop.permute.xlu0 %117 }
 0x161   :  { %v127_v18 = vrot.slane %v118_v14, %v126_v15 }
 0x164   :  { %v121_v17 = vpop.permute.xlu0 %120 }
 0x165   :  { %v131_v19 = vrot.slane %v121_v17, %v126_v15 }
 0x167   :  { %v133_v20 = vsel %vm132_vm1, %v131_v19, %v127_v18 }
 0x168   :  { %v135_v21 = vsel %vm27_vm2, %v133_v20, -inf }
 0x169   :  { %v138_v22 = vsel %vm137_vm3, %v135_v21, -inf }
 0x16a   :  { %139 = vmax.xlane.f32.xlu1 %v138_v22 }
 0x1f7   :  { %v140_v26 = vpop.xlane.xlu1 %139 }
 0x1f8   :  { %v141_v27 = vmax.f32 %v136_v25, %v140_v26 }
 0x1fa   :  { %346 = vst.msk [vmem:[#allocation2] sm:$0x3] %vm19_vm4, %v141_v27  ;;  %vm142_vm5 = vcmp.eq.f32.partialorder %v141_v27, -inf }
 0x1fb   :  { %v143_v28 = vsel %vm142_vm5, 0.0, %v141_v27 }
 0x1fc   :  { %149 = vperm.xlu1 %424, %v143_v28   ;;  %v144_v29 = vsub.f32 %v136_v25, %v143_v28 }
 0x1fe   :  { %v145_v30 = vmul.f32 1.442695, %v144_v29 }
 0x200   :  { %425 = vpow2.f32 %v145_v30 }
 0x20a   :  { %v426_v31 = vpop.eup %425 }
 0x20b   :  { %334 = vperm.xlu1 %424, %v426_v31   ;;  %v156_v46 = vmul.f32 %v426_v31, %v155_v45 }
 0x27b   :  { %v150_v32 = vpop.permute.xlu1 %149 }
 0x27c   :  { %v152_v33 = vsub.f32 %v135_v21, %v150_v32 }
 0x27e   :  { %v153_v34 = vmul.f32 1.442695, %v152_v33 }
 0x280   :  { %427 = vpow2.f32 %v153_v34 }
 0x28a   :  { %v428_v39 = vpop.eup %427  ;;  %v335_v54 = vpop.permute.xlu1 %334 }
 0x28b   :  { %v157_v40 = vsel %vm137_vm3, %v428_v39, 0.0  ;;  %v170_v41 = vrot.slane %v428_v39, %v169_v38  ;;  %v337_v58 = vmul.f32 %v335_v54, %v331_v53 }
 0x28c   :  { %158 = vadd.xlane.f32.xlu0 %v157_v40 }
 0x28d   :  { %v171_v42 = vcombine.high %v170_v41, %v170_v41  ;;  %v178_v43 = vrot.slane %v170_v41, %v169_v38 }
 0x28f   :  { %402 = vmatmul.mubr.msk.f32.vlgmr.msra.gmra.mrb[0].mxu1 %vm186_vm8, %v178_v43  ;;  %v185_v44 = vrot.slane %v171_v42, %v169_v38 }
 0x290   :  { %405 = vmatpush3.msra.mxu1 %v499_v7  ;;  %406 = vmatprep.mubr.msk.f32.mxu1 %vm458_vm7, %v457_v24 }
 0x293   :  { %407 = vmatmul.mubr.msk.f32.vlgmr.msra.gmra.mrb[2].mxu1 %vm186_vm8, %v185_v44 }
 0x319   :  { %v159_v47 = vpop.xlane.xlu0 %158 }
 0x31a   :  { %v160_v48 = vadd.f32 %v159_v47, %v156_v46 }
 0x31c   :  { %162 = vst.msk [vmem:[#allocation3] sm:$0x3] %vm19_vm4, %v160_v48 }
 0x323   :  { %v350_v49 = vld [vmem:[#allocation3] sm:$0x3] }
 0x324   :  { %429 = vrcp.f32 %v350_v49 }
 0x32e   :  { %v430_v50 = vpop.eup %429 }
 0x32f   :  { %355 = vperm.xlu1 %424, %v430_v50  }
 0x362   :  { %v255_v51 = vpop.f32.mrb[0].mxu1 }
 0x363   :  { %v403_v52 = vpop.f32.mrb[1].mxu1 }
 0x366   :  { %v327_v55 = vpop.f32.mrb[2].mxu1 }
 0x367   :  { %v340_v56 = vrot.slane %v327_v55, 7  ;;  %v408_v57 = vpop.f32.mrb[3].mxu1 }
 0x369   :  { %v341_v59 = vsel %vm132_vm1, %v340_v56, %v255_v51 }
 0x36a   :  { %v343_v60 = vadd.f32 %v341_v59, %v337_v58 }
 0x36c   :  { %345 = vst.msk [vmem:[#allocation4] sm:$0x3] %vm22_vm6, %v343_v60 }
 0x373   :  { %v352_v61 = vld [vmem:[#allocation4] sm:$0x3] }
 0x3ae   :  { %v356_v62 = vpop.permute.xlu1 %355 }
 0x3af   :  { %v358_v63 = vmul.f32 %v356_v62, %v352_v61 }
 0x3b1   :  { %359 = vst.msk [vmem:[#allocation5] sm:$0x3] %vm22_vm6, %v358_v63 }
 0x3b2   :  { %442 = shalt.err (!%p439_p4)
}
 0x3b3   :  { %s443_s28 = scalar_lea.hbm %s534_s3, 32 }
 0x3b4   :  { %p444_p5 = scmp.ne.s32.totalorder %s534_s3, %s443_s28  ;;  %p447_p6 = scmp.lt.u32.totalorder %s443_s28, %s534_s3 }
 0x3b6   :  { %p449_p7 = pnand %p447_p6, %p444_p5 }
 0x3b8   :  { %452 = shalt.err (!%p449_p7)
}
 0x3b9   :  { %369 = dma.vmem_to_hbm [thread:$0]  %s367_s1, 32, %s534_s3, [#allocation6]  }
 0x3ba   :  { %453 = dma.done.wait [#allocation6], 32  }
 0x3bb   :  { %454 = vsyncadd [#allocation6], 4294967264 }
 0x3bc   :  { %373 = vsyncpa [#allocation6], 1 }

</bundles_post_ra>
